<compile_context>
chip_gen: v6e
topology: v6e:2x2x1
jax: 0.10.0
libtpu: 0.0.40
codegen_flags: <defaults>
</compile_context>

<pallas_src>
import jax
import jax.numpy as jnp
from jax import lax
from jax.experimental import pallas as pl
from jax.experimental.pallas import tpu as pltpu


# ---------------------------------------------------------------------------
# Feature layout helpers
# ---------------------------------------------------------------------------
def _feat_dims(sample_size):
    # [x_c, y_c, ang_c, x_d, y_d, is_depot, demand, tw0, tw1, st,
    #  row_sorted(S), col_sorted(S), ones]  (+ zero pad to a multiple of 16)
    F = 10 + 2 * sample_size + 1
    Fp = ((F + 15) // 16) * 16
    return F, Fp


# ---------------------------------------------------------------------------
# Pallas kernel (row-major: activations are (rows, features))
# ---------------------------------------------------------------------------
def _rvrptw_kernel(
    x_ref,      # (TR, Fp)   f32   fused node+distance features
    wnd_ref,    # (Fp, 4D)   bf16  -> [node_emb | attr_emb | row_emb | col_emb]
    a_ref,      # (4D, 4D)   bf16  both gating first layers (attr rows are zero)
    bg1_ref,    # (1, 4D)    f32
    wg2_ref,    # (4D, 2)    bf16  both gating logits
    bg2_ref,    # (1, 2)     f32
    wout_ref,   # (3D, 2D)   bf16  fused final combine
    bout_ref,   # (1, 2D)    f32
    out_ref,    # (TR, 2D)   f32   [out_row | out_col]
):
    f32 = jnp.float32
    bf16 = jnp.bfloat16
    D2 = out_ref.shape[1]
    D = D2 // 2

    # (1) fused first-level embeddings: narc = [node | attr | row | col]
    xb = x_ref[...].astype(bf16)
    narc = jnp.dot(xb, wnd_ref[...], preferred_element_type=f32)       # (TR, 4D)

    # (2) both ContextualGating hidden layers in one dot (K = 4D)
    h = jnp.dot(narc.astype(bf16), a_ref[...], preferred_element_type=f32)
    h = jnp.maximum(h + bg1_ref[...], 0.0)                             # (TR, 4D)

    # (3) both gating logits
    logits = jnp.dot(h.astype(bf16), wg2_ref[...],
                     preferred_element_type=f32) + bg2_ref[...]        # (TR, 2)
    # sigmoid with the divide on the EUP slot
    g = pl.reciprocal(1.0 + jnp.exp(-logits), approx=True)

    node_e = narc[:, 0:D]
    attr_e = narc[:, D:2 * D]
    row_e = narc[:, 2 * D:3 * D]
    col_e = narc[:, 3 * D:4 * D]
    g_row = g[:, 0:1]
    g_col = g[:, 1:2]
    comb_row = g_row * node_e + (1.0 - g_row) * row_e
    comb_col = g_col * node_e + (1.0 - g_col) * col_e
    comb3 = jnp.concatenate([comb_row, comb_col, attr_e], axis=1)      # (TR, 3D)

    # (4) fused final combine
    out_ref[...] = (jnp.dot(comb3.astype(bf16), wout_ref[...],
                            preferred_element_type=f32)
                    + bout_ref[...]).astype(out_ref.dtype)


# ---------------------------------------------------------------------------
# Parameters (torch nn.Linear style, stored as (in_features, out_features))
# ---------------------------------------------------------------------------
def init_params(key, embed_dim, sample_size):
    D, S = embed_dim, sample_size

    def lin(k, fan_in, fan_out):
        kw, kb = jax.random.split(k)
        bound = 1.0 / jnp.sqrt(jnp.float32(fan_in))
        W = jax.random.uniform(kw, (fan_in, fan_out), jnp.float32, -bound, bound)
        b = jax.random.uniform(kb, (1, fan_out), jnp.float32, -bound, bound)
        return W, b

    keys = jax.random.split(key, 11)
    p = {}
    p["W_depot"], p["b_depot"] = lin(keys[0], 2, D)        # CoordinateExpert.init_embed_depot
    p["W_city"], p["b_city"] = lin(keys[1], 3, D)          # CoordinateExpert.init_embed
    p["W_row"], p["b_row"] = lin(keys[2], S, D)            # DistanceExpert.row_embed
    p["W_col"], p["b_col"] = lin(keys[3], S, D)            # DistanceExpert.col_embed
    p["Wg1r"], p["bg1r"] = lin(keys[4], 2 * D, 2 * D)      # gating_network_row.gating_fc[0]
    p["Wg2r"], p["bg2r"] = lin(keys[5], 2 * D, 1)          # gating_network_row.gating_fc[2]
    p["Wg1c"], p["bg1c"] = lin(keys[6], 2 * D, 2 * D)      # gating_network_col.gating_fc[0]
    p["Wg2c"], p["bg2c"] = lin(keys[7], 2 * D, 1)          # gating_network_col.gating_fc[2]
    p["W_attr"], p["b_attr"] = lin(keys[8], 4, D)          # init_embed (vrp_attr)
    p["Wcr"], p["b_cr"] = lin(keys[9], 2 * D, D)           # combine_row_embed
    p["Wcc"], p["b_cc"] = lin(keys[10], 2 * D, D)          # combine_col_embed
    return p


def pack_params(p, D, S):
    """Fuse the 13 linears into 4 (in, out) weight slabs (bf16) + f32 biases."""
    f32 = jnp.float32
    bf16 = jnp.bfloat16
    D2, D3, D4 = 2 * D, 3 * D, 4 * D
    F, Fp = _feat_dims(S)
    ones_col = 10 + 2 * S

    # --- first-level fused weight: x (., Fp) @ wnd -> [node|attr|row|col] ---
    wnd = jnp.zeros((Fp, D4), f32)
    wnd = wnd.at[0:3, 0:D].set(p["W_city"])                         # city xy + angle
    wnd = wnd.at[3:5, 0:D].set(p["W_depot"])                        # depot xy
    wnd = wnd.at[5, 0:D].set(p["b_depot"][0] - p["b_city"][0])      # depot bias delta
    wnd = wnd.at[ones_col, 0:D].set(p["b_city"][0])
    wnd = wnd.at[6:10, D:D2].set(p["W_attr"])
    wnd = wnd.at[ones_col, D:D2].set(p["b_attr"][0])
    wnd = wnd.at[10:10 + S, D2:D3].set(p["W_row"])
    wnd = wnd.at[ones_col, D2:D3].set(p["b_row"][0])
    wnd = wnd.at[10 + S:10 + 2 * S, D3:D4].set(p["W_col"])
    wnd = wnd.at[ones_col, D3:D4].set(p["b_col"][0])

    # --- both gating first layers: narc [node|attr|row|col] @ A -> [h_row|h_col]
    A = jnp.zeros((D4, D4), f32)
    A = A.at[0:D, 0:D2].set(p["Wg1r"][0:D])          # node -> row hidden
    A = A.at[D2:D3, 0:D2].set(p["Wg1r"][D:D2])       # row_emb -> row hidden
    A = A.at[0:D, D2:D4].set(p["Wg1c"][0:D])         # node -> col hidden
    A = A.at[D3:D4, D2:D4].set(p["Wg1c"][D:D2])      # col_emb -> col hidden
    bg1 = jnp.concatenate([p["bg1r"], p["bg1c"]], axis=1)           # (1, 4D)

    # --- both gating logits ---
    wg2 = jnp.zeros((D4, 2), f32)
    wg2 = wg2.at[0:D2, 0].set(p["Wg2r"][:, 0])
    wg2 = wg2.at[D2:D4, 1].set(p["Wg2c"][:, 0])
    bg2 = jnp.concatenate([p["bg2r"], p["bg2c"]], axis=1)           # (1, 2)

    # --- fused final combine: [comb_row|comb_col|attr] @ wout -> [out_row|out_col]
    wout = jnp.zeros((D3, D2), f32)
    wout = wout.at[0:D, 0:D].set(p["Wcr"][0:D])
    wout = wout.at[D2:D3, 0:D].set(p["Wcr"][D:D2])
    wout = wout.at[D:D2, D:D2].set(p["Wcc"][0:D])
    wout = wout.at[D2:D3, D:D2].set(p["Wcc"][D:D2])
    bout = jnp.concatenate([p["b_cr"], p["b_cc"]], axis=1)          # (1, 2D)

    return dict(wnd=wnd.astype(bf16), a=A.astype(bf16), bg1=bg1,
                wg2=wg2.astype(bf16), bg2=bg2,
                wout=wout.astype(bf16), bout=bout)


# ---------------------------------------------------------------------------
# JAX glue: DistanceExpert 'prob' sampling (multinomial w/o replacement)
# ---------------------------------------------------------------------------
def _sample_sorted_distances(distance, sample_size, key):
    # TODO(synk): multinomial-without-replacement sampling (Gumbel top-k), the
    # data-dependent gather and the sort have no clean Pallas TPU mapping; kept in JAX glue.
    f32 = jnp.float32
    B, N, _ = distance.shape
    eye = jnp.eye(N, dtype=f32)[None]
    processed = distance * (1.0 - eye) + eye * 1e6
    inv = 1.0 / (processed + 1e-6)
    probs = inv / jnp.sum(inv, axis=-1, keepdims=True)
    u = jax.random.uniform(key, (B, N, N), f32, minval=1e-9, maxval=1.0)
    gumbel = -jnp.log(-jnp.log(u))
    idx = lax.top_k(jnp.log(probs) + gumbel, sample_size)[1]        # (B, N, S)
    row_sorted = jnp.sort(jnp.take_along_axis(distance, idx, axis=2), axis=-1)
    col_sorted = jnp.sort(
        jnp.take_along_axis(jnp.swapaxes(distance, 1, 2), idx, axis=2), axis=-1)
    return row_sorted, col_sorted


# ---------------------------------------------------------------------------
# Wrapper
# ---------------------------------------------------------------------------
def rvrptw_init_embedding(td, params, *, sample_size, key, phase="test",
                          tile_rows=2048):
    f32 = jnp.float32
    locs = td["locs"].astype(f32)                  # (B, N, 2)
    demand = td["demand_linehaul"].astype(f32)     # (B, N)
    tw = td["time_windows"].astype(f32)            # (B, N, 2)
    st = td["service_time"].astype(f32)            # (B, N)
    distance = td["distance_matrix"].astype(f32)   # (B, N, N)
    del phase  # unused for sample_type='prob'

    B, N, _ = locs.shape
    D = params["W_city"].shape[1]
    S = sample_size
    D2 = 2 * D
    assert D % 8 == 0, "embed_dim must be a multiple of 8"
    F, Fp = _feat_dims(S)

    # --- glue: polar feature + attribute concat (depot assumed at node 0) ---
    depot = locs[:, :1, :]
    centered = locs - depot
    angle = jnp.arctan2(centered[..., 1:2], centered[..., 0:1])       # (B, N, 1)
    vrp_attr = jnp.concatenate([demand[..., None], tw, st[..., None]], axis=-1)
    is_dep = jnp.broadcast_to((jnp.arange(N) == 0).astype(f32)[None, :, None],
                              (B, N, 1))
    not_dep = 1.0 - is_dep

    # --- glue: 'prob' sampling of distances ---
    row_sorted, col_sorted = _sample_sorted_distances(distance, S, key)

    ones = jnp.ones((B, N, 1), f32)
    feats = jnp.concatenate(
        [locs * not_dep, angle * not_dep, locs * is_dep, is_dep,
         vrp_attr, row_sorted, col_sorted, ones,
         jnp.zeros((B, N, Fp - F), f32)], axis=-1)                    # (B, N, Fp)

    # --- flatten rows (row-major: rows = sublane axis, no transposes) ---
    R = B * N
    x = feats.reshape(R, Fp)

    r8 = ((R + 7) // 8) * 8
    TR = max(8, (min(int(tile_rows), r8) // 8) * 8)
    # ensure >= 2 grid steps so both v7x TensorCores get work (no-op on v5e/v6e)
    if r8 >= 16 and -(-r8 // TR) < 2:
        TR = ((-(-r8 // 2)) + 7) // 8 * 8
    R_pad = -(-R // TR) * TR
    if R_pad > R:
        x = jnp.pad(x, ((0, R_pad - R), (0, 0)))
    num_tiles = R_pad // TR

    packed = pack_params(params, D, S)
    weights = (packed["wnd"], packed["a"], packed["bg1"], packed["wg2"],
               packed["bg2"], packed["wout"], packed["bout"])

    # VMEM budget: double-buffered I/O + in-kernel intermediates (lane-padded)
    lane = lambda n: ((n + 127) // 128) * 128
    per_row_bytes = (2 * lane(Fp) + 2 * lane(D2) + 10 * lane(4 * D)) * 4
    vmem_limit = int(min(56 * 2**20, max(32 * 2**20, 2 * TR * per_row_bytes)))

    def build(single_buffer_weights):
        def wspec(w):
            kw = {}
            if single_buffer_weights:
                kw["pipeline_mode"] = pl.Buffered(1)   # constants: no double buffer
            return pl.BlockSpec(w.shape, lambda i: (0, 0), **kw)

        return pl.pallas_call(
            _rvrptw_kernel,
            out_shape=jax.ShapeDtypeStruct((R_pad, D2), f32),
            grid_spec=pltpu.PrefetchScalarGridSpec(
                num_scalar_prefetch=0,
                grid=(num_tiles,),
                in_specs=[pl.BlockSpec((TR, Fp), lambda i: (i, 0))]
                         + [wspec(w) for w in weights],
                out_specs=pl.BlockSpec((TR, D2), lambda i: (i, 0)),
            ),
            compiler_params=pltpu.CompilerParams(
                dimension_semantics=("parallel",),
                vmem_limit_bytes=vmem_limit),
        )

    try:
        out = build(True)(x, *weights)
    except Exception:
        # Fallback if pl.Buffered(1) single-buffering is not supported by this
        # jax version on the auto-pipeline path.
        out = build(False)(x, *weights)

    # Padded rows (R..R_pad) carry bias-only garbage: slice them off right here.
    fused = out[:R].reshape(B, N, D2)
    return fused[..., :D], fused[..., D:], distance


# ---------------------------------------------------------------------------
# Pure-JAX f32 reference (mirrors the PyTorch forward) — sanity check only
# ---------------------------------------------------------------------------
def _reference_forward(td, params, *, sample_size, key):
    f32 = jnp.float32
    locs = td["locs"].astype(f32)
    demand = td["demand_linehaul"].astype(f32)
    tw = td["time_windows"].astype(f32)
    st = td["service_time"].astype(f32)
    distance = td["distance_matrix"].astype(f32)
    vrp_attr = jnp.concatenate([demand[..., None], tw, st[..., None]], axis=-1)

    depot = locs[:, :1, :]
    centered = locs - depot
    angle = jnp.arctan2(centered[..., 1:2], centered[..., 0:1])
    coord3 = jnp.concatenate([locs, angle], axis=-1)
    depot_emb = depot @ params["W_depot"] + params["b_depot"]
    city_emb = coord3[:, 1:] @ params["W_city"] + params["b_city"]
    node_emb = jnp.concatenate([depot_emb, city_emb], axis=1)
    attr_emb = vrp_attr @ params["W_attr"] + params["b_attr"]

    row_sorted, col_sorted = _sample_sorted_distances(distance, sample_size, key)
    row_emb = row_sorted @ params["W_row"] + params["b_row"]
    col_emb = col_sorted @ params["W_col"] + params["b_col"]

    def gate(dist_emb, W1, b1, W2, b2):
        cat = jnp.concatenate([node_emb, dist_emb], axis=-1)
        h = jnp.maximum(cat @ W1 + b1, 0.0)
        g = 1.0 / (1.0 + jnp.exp(-(h @ W2 + b2)))
        return g * node_emb + (1.0 - g) * dist_emb

    comb_row = gate(row_emb, params["Wg1r"], params["bg1r"], params["Wg2r"], params["bg2r"])
    comb_col = gate(col_emb, params["Wg1c"], params["bg1c"], params["Wg2c"], params["bg2c"])
    out_row = jnp.concatenate([comb_row, attr_emb], -1) @ params["Wcr"] + params["b_cr"]
    out_col = jnp.concatenate([comb_col, attr_emb], -1) @ params["Wcc"] + params["b_cc"]
    return out_row, out_col


if __name__ == "__main__":
    B, N, D, S = 2, 16, 32, 8   # batch, nodes (incl. depot), embed_dim, sample_size

    key = jax.random.PRNGKey(0)
    k_locs, k_dem, k_tw, k_st, k_par, k_samp = jax.random.split(key, 6)

    locs = jax.random.uniform(k_locs, (B, N, 2), jnp.float32)
    demand = jax.random.uniform(k_dem, (B, N), jnp.float32)
    tw_start = jax.random.uniform(k_tw, (B, N), jnp.float32)
    time_windows = jnp.stack([tw_start, tw_start + 0.5], axis=-1)
    service_time = jax.random.uniform(k_st, (B, N), jnp.float32) * 0.1
    diff = locs[:, :, None, :] - locs[:, None, :, :]
    distance = jnp.sqrt(jnp.sum(diff * diff, axis=-1) + 1e-12)
    distance = distance * (1.0 - jnp.eye(N, dtype=jnp.float32)[None])

    td = dict(locs=locs, demand_linehaul=demand, time_windows=time_windows,
              service_time=service_time, distance_matrix=distance)

    params = init_params(k_par, D, S)

    row_out, col_out, dist = rvrptw_init_embedding(
        td, params, sample_size=S, key=k_samp, phase="test")
    jax.block_until_ready((row_out, col_out, dist))
    assert row_out.shape == (B, N, D) and col_out.shape == (B, N, D)
    assert dist.shape == (B, N, N)

    ref_row, ref_col = _reference_forward(td, params, sample_size=S, key=k_samp)
    err = max(float(jnp.max(jnp.abs(row_out - ref_row))),
              float(jnp.max(jnp.abs(col_out - ref_col))))
    # bf16 MXU operands with f32 accumulation: expected max-abs error is O(1e-2)
    # on this data (a pure-f32 re-association alone would be < 1e-4).
    assert err < 3e-2, f"kernel vs reference mismatch: {err}"
    print("KERNEL_OK")
</pallas_src>

<mosaic_0001>
module attributes {stable_mosaic.version = 11 : i64} {
  func.func @_rvrptw_kernel(%arg0: i32, %arg1: memref<16x32xf32, #tpu.memory_space<vmem>>, %arg2: memref<32x128xbf16, #tpu.memory_space<vmem>>, %arg3: memref<128x128xbf16, #tpu.memory_space<vmem>>, %arg4: memref<1x128xf32, #tpu.memory_space<vmem>>, %arg5: memref<128x2xbf16, #tpu.memory_space<vmem>>, %arg6: memref<1x2xf32, #tpu.memory_space<vmem>>, %arg7: memref<96x64xbf16, #tpu.memory_space<vmem>>, %arg8: memref<1x64xf32, #tpu.memory_space<vmem>>, %arg9: memref<16x64xf32, #tpu.memory_space<vmem>>) attributes {dimension_semantics = [#tpu.dimension_semantics<parallel>], iteration_bounds = array<i64: 2>, scalar_prefetch = 0 : i64, scratch_operands = 0 : i64, tpu.core_type = #tpu.core_type<tc>, window_params = [{transform_indices = @transform_0, window_bounds = array<i64: 16, 32>}, {pipeline_mode = #tpu.pipeline_mode<synchronous>, transform_indices = @transform_1, window_bounds = array<i64: 32, 128>}, {pipeline_mode = #tpu.pipeline_mode<synchronous>, transform_indices = @transform_2, window_bounds = array<i64: 128, 128>}, {pipeline_mode = #tpu.pipeline_mode<synchronous>, transform_indices = @transform_3, window_bounds = array<i64: 1, 128>}, {pipeline_mode = #tpu.pipeline_mode<synchronous>, transform_indices = @transform_4, window_bounds = array<i64: 128, 2>}, {pipeline_mode = #tpu.pipeline_mode<synchronous>, transform_indices = @transform_5, window_bounds = array<i64: 1, 2>}, {pipeline_mode = #tpu.pipeline_mode<synchronous>, transform_indices = @transform_6, window_bounds = array<i64: 96, 64>}, {pipeline_mode = #tpu.pipeline_mode<synchronous>, transform_indices = @transform_7, window_bounds = array<i64: 1, 64>}, {transform_indices = @transform_8, window_bounds = array<i64: 16, 64>}]} {
    %c0 = arith.constant 0 : index
    %c0_0 = arith.constant 0 : index
    %0 = vector.load %arg1[%c0, %c0_0] : memref<16x32xf32, #tpu.memory_space<vmem>>, vector<16x32xf32>
    %1 = arith.truncf %0 : vector<16x32xf32> to vector<16x32xbf16>
    %c0_1 = arith.constant 0 : index
    %c0_2 = arith.constant 0 : index
    %2 = vector.load %arg2[%c0_1, %c0_2] : memref<32x128xbf16, #tpu.memory_space<vmem>>, vector<32x128xbf16>
    %cst = arith.constant dense<0.000000e+00> : vector<16x128xf32>
    %3 = tpu.matmul %1, %2, %cst {dimension_numbers = #tpu.dot_dimension_numbers<[1], [0], [0], [1], [0, 0, 1, 1], [], []>} : vector<16x32xbf16>, vector<32x128xbf16>, vector<16x128xf32> -> vector<16x128xf32>
    %4 = arith.truncf %3 : vector<16x128xf32> to vector<16x128xbf16>
    %c0_3 = arith.constant 0 : index
    %c0_4 = arith.constant 0 : index
    %5 = vector.load %arg3[%c0_3, %c0_4] : memref<128x128xbf16, #tpu.memory_space<vmem>>, vector<128x128xbf16>
    %cst_5 = arith.constant dense<0.000000e+00> : vector<16x128xf32>
    %6 = tpu.matmul %4, %5, %cst_5 {dimension_numbers = #tpu.dot_dimension_numbers<[1], [0], [0], [1], [0, 0, 1, 1], [], []>} : vector<16x128xbf16>, vector<128x128xbf16>, vector<16x128xf32> -> vector<16x128xf32>
    %c0_6 = arith.constant 0 : index
    %c0_7 = arith.constant 0 : index
    %7 = vector.load %arg4[%c0_6, %c0_7] : memref<1x128xf32, #tpu.memory_space<vmem>>, vector<1x128xf32>
    %8 = vector.broadcast %7 : vector<1x128xf32> to vector<16x128xf32>
    %9 = arith.addf %6, %8 : vector<16x128xf32>
    %cst_8 = arith.constant 0.000000e+00 : f32
    %10 = vector.broadcast %cst_8 : f32 to vector<16x128xf32>
    %11 = arith.maximumf %9, %10 : vector<16x128xf32>
    %12 = arith.truncf %11 : vector<16x128xf32> to vector<16x128xbf16>
    %c0_9 = arith.constant 0 : index
    %c0_10 = arith.constant 0 : index
    %13 = vector.load %arg5[%c0_9, %c0_10] : memref<128x2xbf16, #tpu.memory_space<vmem>>, vector<128x2xbf16>
    %cst_11 = arith.constant dense<0.000000e+00> : vector<16x2xf32>
    %14 = tpu.matmul %12, %13, %cst_11 {dimension_numbers = #tpu.dot_dimension_numbers<[1], [0], [0], [1], [0, 0, 1, 1], [], []>} : vector<16x128xbf16>, vector<128x2xbf16>, vector<16x2xf32> -> vector<16x2xf32>
    %c0_12 = arith.constant 0 : index
    %c0_13 = arith.constant 0 : index
    %15 = vector.load %arg6[%c0_12, %c0_13] : memref<1x2xf32, #tpu.memory_space<vmem>>, vector<1x2xf32>
    %16 = vector.broadcast %15 : vector<1x2xf32> to vector<16x2xf32>
    %17 = arith.addf %14, %16 : vector<16x2xf32>
    %cst_14 = arith.constant 0.000000e+00 : f32
    %18 = vector.broadcast %cst_14 : f32 to vector<16x2xf32>
    %19 = arith.subf %18, %17 : vector<16x2xf32>
    %20 = math.exp %19 : vector<16x2xf32>
    %cst_15 = arith.constant 1.000000e+00 : f32
    %21 = vector.broadcast %cst_15 : f32 to vector<16x2xf32>
    %22 = arith.addf %21, %20 : vector<16x2xf32>
    %23 = tpu.reciprocal %22 {approx = true} : vector<16x2xf32> -> vector<16x2xf32>
    %24 = vector.extract_strided_slice %3 {offsets = [0, 0], sizes = [16, 32], strides = [1, 1]} : vector<16x128xf32> to vector<16x32xf32>
    %25 = vector.extract_strided_slice %3 {offsets = [0, 32], sizes = [16, 32], strides = [1, 1]} : vector<16x128xf32> to vector<16x32xf32>
    %26 = vector.extract_strided_slice %3 {offsets = [0, 64], sizes = [16, 32], strides = [1, 1]} : vector<16x128xf32> to vector<16x32xf32>
    %27 = vector.extract_strided_slice %3 {offsets = [0, 96], sizes = [16, 32], strides = [1, 1]} : vector<16x128xf32> to vector<16x32xf32>
    %28 = vector.extract_strided_slice %23 {offsets = [0, 0], sizes = [16, 1], strides = [1, 1]} : vector<16x2xf32> to vector<16x1xf32>
    %29 = vector.extract_strided_slice %23 {offsets = [0, 1], sizes = [16, 1], strides = [1, 1]} : vector<16x2xf32> to vector<16x1xf32>
    %30 = vector.broadcast %28 : vector<16x1xf32> to vector<16x32xf32>
    %31 = arith.mulf %30, %24 : vector<16x32xf32>
    %cst_16 = arith.constant 1.000000e+00 : f32
    %32 = vector.broadcast %cst_16 : f32 to vector<16x1xf32>
    %33 = arith.subf %32, %28 : vector<16x1xf32>
    %34 = vector.broadcast %33 : vector<16x1xf32> to vector<16x32xf32>
    %35 = arith.mulf %34, %26 : vector<16x32xf32>
    %36 = arith.addf %31, %35 : vector<16x32xf32>
    %37 = vector.broadcast %29 : vector<16x1xf32> to vector<16x32xf32>
    %38 = arith.mulf %37, %24 : vector<16x32xf32>
    %cst_17 = arith.constant 1.000000e+00 : f32
    %39 = vector.broadcast %cst_17 : f32 to vector<16x1xf32>
    %40 = arith.subf %39, %29 : vector<16x1xf32>
    %41 = vector.broadcast %40 : vector<16x1xf32> to vector<16x32xf32>
    %42 = arith.mulf %41, %27 : vector<16x32xf32>
    %43 = arith.addf %38, %42 : vector<16x32xf32>
    %44 = tpu.concatenate %36, %43, %25 in 1 : vector<16x32xf32>, vector<16x32xf32>, vector<16x32xf32> -> vector<16x96xf32>
    %45 = arith.truncf %44 : vector<16x96xf32> to vector<16x96xbf16>
    %c0_18 = arith.constant 0 : index
    %c0_19 = arith.constant 0 : index
    %46 = vector.load %arg7[%c0_18, %c0_19] : memref<96x64xbf16, #tpu.memory_space<vmem>>, vector<96x64xbf16>
    %cst_20 = arith.constant dense<0.000000e+00> : vector<16x64xf32>
    %47 = tpu.matmul %45, %46, %cst_20 {dimension_numbers = #tpu.dot_dimension_numbers<[1], [0], [0], [1], [0, 0, 1, 1], [], []>} : vector<16x96xbf16>, vector<96x64xbf16>, vector<16x64xf32> -> vector<16x64xf32>
    %c0_21 = arith.constant 0 : index
    %c0_22 = arith.constant 0 : index
    %48 = vector.load %arg8[%c0_21, %c0_22] : memref<1x64xf32, #tpu.memory_space<vmem>>, vector<1x64xf32>
    %49 = vector.broadcast %48 : vector<1x64xf32> to vector<16x64xf32>
    %50 = arith.addf %47, %49 : vector<16x64xf32>
    %c0_23 = arith.constant 0 : index
    %c0_24 = arith.constant 0 : index
    %51 = vector.load %arg9[%c0_23, %c0_24] : memref<16x64xf32, #tpu.memory_space<vmem>>, vector<16x64xf32>
    tpu.vector_store %arg9[%c0_23, %c0_24], %50 {strides = array<i32>} : memref<16x64xf32, #tpu.memory_space<vmem>>, vector<16x64xf32>,
    return
  }
  func.func @transform_0(%arg0: i32) -> (i32, i32) {
    %c0_i32 = arith.constant 0 : i32
    %c0_i32_0 = arith.constant 0 : i32
    return %arg0, %c0_i32 : i32, i32
  }
  func.func @transform_1(%arg0: i32) -> (i32, i32) {
    %c0_i32 = arith.constant 0 : i32
    %c0_i32_0 = arith.constant 0 : i32
    %c0_i32_1 = arith.constant 0 : i32
    return %c0_i32, %c0_i32_0 : i32, i32
  }
  func.func @transform_2(%arg0: i32) -> (i32, i32) {
    %c0_i32 = arith.constant 0 : i32
    %c0_i32_0 = arith.constant 0 : i32
    %c0_i32_1 = arith.constant 0 : i32
    return %c0_i32, %c0_i32_0 : i32, i32
  }
  func.func @transform_3(%arg0: i32) -> (i32, i32) {
    %c0_i32 = arith.constant 0 : i32
    %c0_i32_0 = arith.constant 0 : i32
    %c0_i32_1 = arith.constant 0 : i32
    return %c0_i32, %c0_i32_0 : i32, i32
  }
  func.func @transform_4(%arg0: i32) -> (i32, i32) {
    %c0_i32 = arith.constant 0 : i32
    %c0_i32_0 = arith.constant 0 : i32
    %c0_i32_1 = arith.constant 0 : i32
    return %c0_i32, %c0_i32_0 : i32, i32
  }
  func.func @transform_5(%arg0: i32) -> (i32, i32) {
    %c0_i32 = arith.constant 0 : i32
    %c0_i32_0 = arith.constant 0 : i32
    %c0_i32_1 = arith.constant 0 : i32
    return %c0_i32, %c0_i32_0 : i32, i32
  }
  func.func @transform_6(%arg0: i32) -> (i32, i32) {
    %c0_i32 = arith.constant 0 : i32
    %c0_i32_0 = arith.constant 0 : i32
    %c0_i32_1 = arith.constant 0 : i32
    return %c0_i32, %c0_i32_0 : i32, i32
  }
  func.func @transform_7(%arg0: i32) -> (i32, i32) {
    %c0_i32 = arith.constant 0 : i32
    %c0_i32_0 = arith.constant 0 : i32
    %c0_i32_1 = arith.constant 0 : i32
    return %c0_i32, %c0_i32_0 : i32, i32
  }
  func.func @transform_8(%arg0: i32) -> (i32, i32) {
    %c0_i32 = arith.constant 0 : i32
    %c0_i32_0 = arith.constant 0 : i32
    return %arg0, %c0_i32 : i32, i32
  }
}

module attributes {stable_mosaic.version = 11 : i64} {
  func.func @_rvrptw_kernel(%arg0: i32, %arg1: memref<16x32xf32, #tpu.memory_space<vmem>>, %arg2: memref<32x128xbf16, #tpu.memory_space<vmem>>, %arg3: memref<128x128xbf16, #tpu.memory_space<vmem>>, %arg4: memref<1x128xf32, #tpu.memory_space<vmem>>, %arg5: memref<128x2xbf16, #tpu.memory_space<vmem>>, %arg6: memref<1x2xf32, #tpu.memory_space<vmem>>, %arg7: memref<96x64xbf16, #tpu.memory_space<vmem>>, %arg8: memref<1x64xf32, #tpu.memory_space<vmem>>, %arg9: memref<16x64xf32, #tpu.memory_space<vmem>>) attributes {dimension_semantics = [#tpu.dimension_semantics<parallel>], iteration_bounds = array<i64: 2>, scalar_prefetch = 0 : i64, scratch_operands = 0 : i64, tpu.core_type = #tpu.core_type<tc>, window_params = [{transform_indices = @transform_0, window_bounds = array<i64: 16, 32>}, {pipeline_mode = #tpu.pipeline_mode<synchronous>, transform_indices = @transform_1, window_bounds = array<i64: 32, 128>}, {pipeline_mode = #tpu.pipeline_mode<synchronous>, transform_indices = @transform_2, window_bounds = array<i64: 128, 128>}, {pipeline_mode = #tpu.pipeline_mode<synchronous>, transform_indices = @transform_3, window_bounds = array<i64: 1, 128>}, {pipeline_mode = #tpu.pipeline_mode<synchronous>, transform_indices = @transform_4, window_bounds = array<i64: 128, 2>}, {pipeline_mode = #tpu.pipeline_mode<synchronous>, transform_indices = @transform_5, window_bounds = array<i64: 1, 2>}, {pipeline_mode = #tpu.pipeline_mode<synchronous>, transform_indices = @transform_6, window_bounds = array<i64: 96, 64>}, {pipeline_mode = #tpu.pipeline_mode<synchronous>, transform_indices = @transform_7, window_bounds = array<i64: 1, 64>}, {transform_indices = @transform_8, window_bounds = array<i64: 16, 64>}]} {
    %c0 = arith.constant 0 : index
    %c0_0 = arith.constant 0 : index
    %0 = vector.load %arg1[%c0, %c0_0] : memref<16x32xf32, #tpu.memory_space<vmem>>, vector<16x32xf32>
    %1 = arith.truncf %0 : vector<16x32xf32> to vector<16x32xbf16>
    %c0_1 = arith.constant 0 : index
    %c0_2 = arith.constant 0 : index
    %2 = vector.load %arg2[%c0_1, %c0_2] : memref<32x128xbf16, #tpu.memory_space<vmem>>, vector<32x128xbf16>
    %cst = arith.constant dense<0.000000e+00> : vector<16x128xf32>
    %3 = tpu.matmul %1, %2, %cst {dimension_numbers = #tpu.dot_dimension_numbers<[1], [0], [0], [1], [0, 0, 1, 1], [], []>} : vector<16x32xbf16>, vector<32x128xbf16>, vector<16x128xf32> -> vector<16x128xf32>
    %4 = arith.truncf %3 : vector<16x128xf32> to vector<16x128xbf16>
    %c0_3 = arith.constant 0 : index
    %c0_4 = arith.constant 0 : index
    %5 = vector.load %arg3[%c0_3, %c0_4] : memref<128x128xbf16, #tpu.memory_space<vmem>>, vector<128x128xbf16>
    %cst_5 = arith.constant dense<0.000000e+00> : vector<16x128xf32>
    %6 = tpu.matmul %4, %5, %cst_5 {dimension_numbers = #tpu.dot_dimension_numbers<[1], [0], [0], [1], [0, 0, 1, 1], [], []>} : vector<16x128xbf16>, vector<128x128xbf16>, vector<16x128xf32> -> vector<16x128xf32>
    %c0_6 = arith.constant 0 : index
    %c0_7 = arith.constant 0 : index
    %7 = vector.load %arg4[%c0_6, %c0_7] : memref<1x128xf32, #tpu.memory_space<vmem>>, vector<1x128xf32>
    %8 = vector.broadcast %7 : vector<1x128xf32> to vector<16x128xf32>
    %9 = arith.addf %6, %8 : vector<16x128xf32>
    %cst_8 = arith.constant 0.000000e+00 : f32
    %10 = vector.broadcast %cst_8 : f32 to vector<16x128xf32>
    %11 = arith.maximumf %9, %10 : vector<16x128xf32>
    %12 = arith.truncf %11 : vector<16x128xf32> to vector<16x128xbf16>
    %c0_9 = arith.constant 0 : index
    %c0_10 = arith.constant 0 : index
    %13 = vector.load %arg5[%c0_9, %c0_10] : memref<128x2xbf16, #tpu.memory_space<vmem>>, vector<128x2xbf16>
    %cst_11 = arith.constant dense<0.000000e+00> : vector<16x2xf32>
    %14 = tpu.matmul %12, %13, %cst_11 {dimension_numbers = #tpu.dot_dimension_numbers<[1], [0], [0], [1], [0, 0, 1, 1], [], []>} : vector<16x128xbf16>, vector<128x2xbf16>, vector<16x2xf32> -> vector<16x2xf32>
    %c0_12 = arith.constant 0 : index
    %c0_13 = arith.constant 0 : index
    %15 = vector.load %arg6[%c0_12, %c0_13] : memref<1x2xf32, #tpu.memory_space<vmem>>, vector<1x2xf32>
    %16 = vector.broadcast %15 : vector<1x2xf32> to vector<16x2xf32>
    %17 = arith.addf %14, %16 : vector<16x2xf32>
    %cst_14 = arith.constant 0.000000e+00 : f32
    %18 = vector.broadcast %cst_14 : f32 to vector<16x2xf32>
    %19 = arith.subf %18, %17 : vector<16x2xf32>
    %20 = math.exp %19 : vector<16x2xf32>
    %cst_15 = arith.constant 1.000000e+00 : f32
    %21 = vector.broadcast %cst_15 : f32 to vector<16x2xf32>
    %22 = arith.addf %21, %20 : vector<16x2xf32>
    %23 = tpu.reciprocal %22 {approx = true} : vector<16x2xf32> -> vector<16x2xf32>
    %24 = vector.extract_strided_slice %3 {offsets = [0, 0], sizes = [16, 32], strides = [1, 1]} : vector<16x128xf32> to vector<16x32xf32>
    %25 = vector.extract_strided_slice %3 {offsets = [0, 32], sizes = [16, 32], strides = [1, 1]} : vector<16x128xf32> to vector<16x32xf32>
    %26 = vector.extract_strided_slice %3 {offsets = [0, 64], sizes = [16, 32], strides = [1, 1]} : vector<16x128xf32> to vector<16x32xf32>
    %27 = vector.extract_strided_slice %3 {offsets = [0, 96], sizes = [16, 32], strides = [1, 1]} : vector<16x128xf32> to vector<16x32xf32>
    %28 = vector.extract_strided_slice %23 {offsets = [0, 0], sizes = [16, 1], strides = [1, 1]} : vector<16x2xf32> to vector<16x1xf32>
    %29 = vector.extract_strided_slice %23 {offsets = [0, 1], sizes = [16, 1], strides = [1, 1]} : vector<16x2xf32> to vector<16x1xf32>
    %30 = vector.broadcast %28 : vector<16x1xf32> to vector<16x32xf32>
    %31 = arith.mulf %30, %24 : vector<16x32xf32>
    %cst_16 = arith.constant 1.000000e+00 : f32
    %32 = vector.broadcast %cst_16 : f32 to vector<16x1xf32>
    %33 = arith.subf %32, %28 : vector<16x1xf32>
    %34 = vector.broadcast %33 : vector<16x1xf32> to vector<16x32xf32>
    %35 = arith.mulf %34, %26 : vector<16x32xf32>
    %36 = arith.addf %31, %35 : vector<16x32xf32>
    %37 = vector.broadcast %29 : vector<16x1xf32> to vector<16x32xf32>
    %38 = arith.mulf %37, %24 : vector<16x32xf32>
    %cst_17 = arith.constant 1.000000e+00 : f32
    %39 = vector.broadcast %cst_17 : f32 to vector<16x1xf32>
    %40 = arith.subf %39, %29 : vector<16x1xf32>
    %41 = vector.broadcast %40 : vector<16x1xf32> to vector<16x32xf32>
    %42 = arith.mulf %41, %27 : vector<16x32xf32>
    %43 = arith.addf %38, %42 : vector<16x32xf32>
    %44 = tpu.concatenate %36, %43, %25 in 1 : vector<16x32xf32>, vector<16x32xf32>, vector<16x32xf32> -> vector<16x96xf32>
    %45 = arith.truncf %44 : vector<16x96xf32> to vector<16x96xbf16>
    %c0_18 = arith.constant 0 : index
    %c0_19 = arith.constant 0 : index
    %46 = vector.load %arg7[%c0_18, %c0_19] : memref<96x64xbf16, #tpu.memory_space<vmem>>, vector<96x64xbf16>
    %cst_20 = arith.constant dense<0.000000e+00> : vector<16x64xf32>
    %47 = tpu.matmul %45, %46, %cst_20 {dimension_numbers = #tpu.dot_dimension_numbers<[1], [0], [0], [1], [0, 0, 1, 1], [], []>} : vector<16x96xbf16>, vector<96x64xbf16>, vector<16x64xf32> -> vector<16x64xf32>
    %c0_21 = arith.constant 0 : index
    %c0_22 = arith.constant 0 : index
    %48 = vector.load %arg8[%c0_21, %c0_22] : memref<1x64xf32, #tpu.memory_space<vmem>>, vector<1x64xf32>
    %49 = vector.broadcast %48 : vector<1x64xf32> to vector<16x64xf32>
    %50 = arith.addf %47, %49 : vector<16x64xf32>
    %c0_23 = arith.constant 0 : index
    %c0_24 = arith.constant 0 : index
    %51 = vector.load %arg9[%c0_23, %c0_24] : memref<16x64xf32, #tpu.memory_space<vmem>>, vector<16x64xf32>
    tpu.vector_store %arg9[%c0_23, %c0_24], %50 {strides = array<i32>} : memref<16x64xf32, #tpu.memory_space<vmem>>, vector<16x64xf32>,
    return
  }
  func.func @transform_0(%arg0: i32) -> (i32, i32) {
    %c0_i32 = arith.constant 0 : i32
    %c0_i32_0 = arith.constant 0 : i32
    return %arg0, %c0_i32 : i32, i32
  }
  func.func @transform_1(%arg0: i32) -> (i32, i32) {
    %c0_i32 = arith.constant 0 : i32
    %c0_i32_0 = arith.constant 0 : i32
    %c0_i32_1 = arith.constant 0 : i32
    return %c0_i32, %c0_i32_0 : i32, i32
  }
  func.func @transform_2(%arg0: i32) -> (i32, i32) {
    %c0_i32 = arith.constant 0 : i32
    %c0_i32_0 = arith.constant 0 : i32
    %c0_i32_1 = arith.constant 0 : i32
    return %c0_i32, %c0_i32_0 : i32, i32
  }
  func.func @transform_3(%arg0: i32) -> (i32, i32) {
    %c0_i32 = arith.constant 0 : i32
    %c0_i32_0 = arith.constant 0 : i32
    %c0_i32_1 = arith.constant 0 : i32
    return %c0_i32, %c0_i32_0 : i32, i32
  }
  func.func @transform_4(%arg0: i32) -> (i32, i32) {
    %c0_i32 = arith.constant 0 : i32
    %c0_i32_0 = arith.constant 0 : i32
    %c0_i32_1 = arith.constant 0 : i32
    return %c0_i32, %c0_i32_0 : i32, i32
  }
  func.func @transform_5(%arg0: i32) -> (i32, i32) {
    %c0_i32 = arith.constant 0 : i32
    %c0_i32_0 = arith.constant 0 : i32
    %c0_i32_1 = arith.constant 0 : i32
    return %c0_i32, %c0_i32_0 : i32, i32
  }
  func.func @transform_6(%arg0: i32) -> (i32, i32) {
    %c0_i32 = arith.constant 0 : i32
    %c0_i32_0 = arith.constant 0 : i32
    %c0_i32_1 = arith.constant 0 : i32
    return %c0_i32, %c0_i32_0 : i32, i32
  }
  func.func @transform_7(%arg0: i32) -> (i32, i32) {
    %c0_i32 = arith.constant 0 : i32
    %c0_i32_0 = arith.constant 0 : i32
    %c0_i32_1 = arith.constant 0 : i32
    return %c0_i32, %c0_i32_0 : i32, i32
  }
  func.func @transform_8(%arg0: i32) -> (i32, i32) {
    %c0_i32 = arith.constant 0 : i32
    %c0_i32_0 = arith.constant 0 : i32
    return %arg0, %c0_i32 : i32, i32
  }
}

</mosaic_0001>

<bundles_post_ra>
// kernel: tpu_custom_call.1
= control target key start
LH: loop header
LB: loop body
LE: loop exit
PB: predicated region body
PF: predicated region fallthrough
CT: control target
= control target key end

     0   :  { %13 = vsyncpa [#allocation3], 0  ;;  %s1462_s0 = inlined_call_operand.vmem [shape: f32[32,32], index: 0, kind: input, shape index: {}]   ;;  %s1463_s1 = inlined_call_operand.vmem [shape: bf16[32,128], index: 1, kind: input, shape index: {}]   ;;  %s1464_s2 = inlined_call_operand.vmem [shape: bf16[128,128], index: 2, kind: input, shape index: {}]   ;;  %s1465_s3 = inlined_call_operand.vmem [shape: f32[1,128], index: 3, kind: input, shape index: {}]   ;;  %s1466_s4 = inlined_call_operand.vmem [shape: bf16[128,2], index: 4, kind: input, shape index: {}]   ;;  %s1467_s5 = inlined_call_operand.vmem [shape: f32[1,2], index: 5, kind: input, shape index: {}]   ;;  %s1468_s6 = inlined_call_operand.vmem [shape: bf16[96,64], index: 6, kind: input, shape index: {}]   ;;  %s1469_s7 = inlined_call_operand.vmem [shape: f32[1,64], index: 7, kind: input, shape index: {}]   ;;  %s1470_s8 = inlined_call_operand.hbm [shape: f32[32,64], index: 8, kind: output, shape index: {}]  }
   0x1   :  { %15 = vsyncpa [#allocation3 + $0x1], 0  ;;  %s1221_s27 = smov 0   ;;  %s1223_s28 = smov 0  }
   0x2   :  { %s1225_s29 = smov 0   ;;  %s1227_s30 = smov 0  }
   0x3 LB: > { %s1242_s9 = sadd.s32 4294967295, %s1165_s30   ;;  %s876_s10 = sadd.s32 4294967294, %s1165_s30   ;;  %s1165_s30 = sphi %s1227_s30, %s1476_s30   ;;  %s1161_s29 = sphi %s1225_s29, %s1475_s29   ;;  %s1157_s28 = sphi %s1223_s28, %s1474_s28   ;;  %s1153_s27 = sphi %s1221_s27, %s1473_s27  }
   0x4   : > { %s1246_s11 = sadd.s32 1, %s1165_s30   ;;  %s201_s12 = sadd.s32 1, %s1161_s29 }
   0x5   : > { %s198_s13 = ssub.s32 %s1165_s30, %s1246_s11  ;;  %p211_p0 = scmp.ne.s32.totalorder %s1161_s29, %s1157_s28 }
   0x6   : > { %p199_p1 = scmp.eq.s32.totalorder %s198_s13, 0  ;;  %p212_p2 = scmp.eq.s32.totalorder %s1242_s9, 1 }
   0x7   : > { %p217_p3 = scmp.ne.s32.totalorder %s1157_s28, %s1153_s27  ;;  %p218_p4 = scmp.eq.s32.totalorder %s876_s10, 1 }
   0x8   : > { %s1257_s14 = scalar_select %p199_p1, %s1161_s29, %s201_s12  }
   0x9   : > { %p1259_p5 = por %p212_p2, %p211_p0  ;;  %p1263_p6 = por %p218_p4, %p217_p3 }
   0xa   : > { %p879_p7 = scmp.ge.s32.totalorder %s1165_s30, 1  ;;  %p266_p8 = scmp.lt.s32.totalorder %s1165_s30, 3 }
   0xc   : > { %p267_p9 = pnand %p879_p7, %p266_p8 }
   0xd   : > { %s881_s21 = sshll.u32 (!%p267_p9), %s1242_s9, 1  ;;  %s1171_s23 = smov (!%p267_p9), 32  }
   0xe   : > { %270 = sbr.rel (%p267_p9) target bundleno = 1244 (0x4dc), region = 52  ;;  %p301_p10 = scmp.lt.s32.totalorder (!%p267_p9), %s881_s21, 3 }
   0xf   : > { %s1172_s24 = smov (!%p267_p9), 64   ;;  %s917_s17 = sshll.u32 (!%p267_p9), %s1242_s9, 8 }
  0x10   : > { %s1419_s20 = scalar_lea.hbm (!%p267_p9), %s1470_s8, %s917_s17  ;;  %s1173_s22 = smov (!%p267_p9), [#allocation2]  }
  0x13   : > { %v1073_v0 = vld [vmem:[%s1463_s1 + $0x8] sm:$0xff]   ;;  %v1167_v1 = vmov 0.0   ;;  %v1074_v2 = vld [vmem:[%s1463_s1] sm:$0xff]   ;;  %vm1168_vm0 = vmmov 0   ;;  %v1075_v3 = vld [vmem:[%s1464_s2 + $0x38] sm:$0xff]   ;;  %s1478_s21 = smov (!%p301_p10, %s881_s21), 3 }
  0x14   : > { %946 = vmatprep.subr.bf16.mxu0 %v1167_v1  ;;  %954 = vmatprep.subr.bf16.mxu1 %v1167_v1  ;;  %v1076_v4 = vld [vmem:[%s1464_s2 + $0x30] sm:$0xff]   ;;  %s882_s26 = sshll.u32 %s1478_s21, 3  ;;  %v1077_v5 = vld [vmem:[%s1464_s2 + $0x28] sm:$0xff]   ;;  %vm327_vm1 = vcmask 261120   ;;  %v1078_v9 = vld [vmem:[%s1464_s2 + $0x20] sm:$0xff]   ;;  %v1169_v37 = vmov 1  }
  0x15   : > { %947 = vmatpush3.bf16.msra.mxu0 %v1073_v0  ;;  %950 = vmatprep.mubr.msk.bf16.mxu0 %vm1168_vm0, %v1167_v1  ;;  %s304_s13 = scalar_lea.vmem %s1462_s0, %s882_s26  ;;  %v1079_v10 = vld [vmem:[%s1464_s2 + $0x18] sm:$0xff]   ;;  %v1080_v11 = vld [vmem:[%s1464_s2 + $0x10] sm:$0xff]   ;;  %v1081_v12 = vld [vmem:[%s1464_s2 + $0x8] sm:$0xff]   ;;  %v1170_v38 = vmov 0   ;;  %vm694_vm2 = vcmask 523264   ;;  %vm753_vm3 = vcmask 785408  }
  0x16   : > { %948 = vmatprep.subr.bf16.mxu0 %v1167_v1  ;;  %970 = vmatprep.mubr.msk.bf16.mxu1 %vm1168_vm0, %v1167_v1  ;;  %v308_v6 = vld [vmem:[%s304_s13] sm:$0xff]  ;;  %v309_v7 = vld [vmem:[%s304_s13 + $0x8] sm:$0xff]  ;;  %v1083_v14 = vld [vmem:[%s1466_s4 + $0x38] sm:$0xff]  }
  0x17   : > { %955 = vmatpush3.bf16.msra.mxu1 %v1075_v3  ;;  %v310_v8 = vpack.c.bf16 %v309_v7, %v308_v6  ;;  %v1082_v13 = vld [vmem:[%s1464_s2] sm:$0xff]   ;;  %v1084_v15 = vld [vmem:[%s1466_s4 + $0x30] sm:$0xff]   ;;  %v1085_v16 = vld [vmem:[%s1466_s4 + $0x28] sm:$0xff]   ;;  %1057 = vset.pattern.permute.xlu0 %v1169_v37 }
  0x18   : > { %956 = vmatprep.subr.bf16.mxu1 %v1167_v1  ;;  %v1086_v17 = vld [vmem:[%s1466_s4 + $0x20] sm:$0xff]   ;;  %v1087_v18 = vld [vmem:[%s1466_s4 + $0x18] sm:$0xff]   ;;  %v1088_v24 = vld [vmem:[%s1466_s4 + $0x10] sm:$0xff]   ;;  %1058 = vset.pattern.permute.xlu1 %v1170_v38 }
  0x19   : > { %949 = vmatpush3.bf16.msra.mxu0 %v1074_v2  ;;  %v1089_v25 = vld [vmem:[%s1466_s4 + $0x8] sm:$0xff]   ;;  %v1090_v26 = vld [vmem:[%s1466_s4] sm:$0xff]   ;;  %v1093_v6 = vld [vmem:[%s1468_s6 + $0x18] sm:$0xff]  }
  0x1a   : > { %974 = vmatprep.subr.bf16.mxu0 %v1167_v1  ;;  %v886_v27 = vld [vmem:[%s1465_s3] ss:$0 sm:$0xff]  ;;  %v1091_v2 = vld [vmem:[%s1468_s6 + $0x28] sm:$0xff]   ;;  %v1094_v7 = vld [vmem:[%s1468_s6 + $0x10] sm:$0xff]  }
  0x1b   : > { %957 = vmatpush3.bf16.msra.mxu1 %v1076_v4  ;;  %v895_v39 = vld [vmem:[%s1467_s5] ss:$0 sm:$0xff] }
  0x1c   : > { %958 = vmatprep.subr.bf16.mxu1 %v1167_v1  ;;  %951 = vmatmul.mubr.msk.bf16.vlgmr.msra.gmra.mxu0 %vm327_vm1, %v310_v8  ;;  %v1095_v8 = vld [vmem:[%s1468_s6 + $0x8] sm:$0xff]  }
  0x1d   : > { %990 = vmatprep.mubr.msk.bf16.mxu0 %vm1168_vm0, %v1167_v1  ;;  %975 = vmatpush3.bf16.msra.mxu0 %v1083_v14 }
  0x1e   : > { %976 = vmatprep.subr.bf16.mxu0 %v1167_v1 }
  0x1f   : > { %959 = vmatpush3.bf16.msra.mxu1 %v1077_v5  ;;  %v1092_v5 = vld [vmem:[%s1468_s6 + $0x20] sm:$0xff]  }
  0x20   : > { %960 = vmatprep.subr.bf16.mxu1 %v1167_v1 }
  0x21   : > { %977 = vmatpush3.bf16.msra.mxu0 %v1084_v15 }
  0x22   : > { %978 = vmatprep.subr.bf16.mxu0 %v1167_v1 }
  0x23   : > { %961 = vmatpush3.bf16.msra.mxu1 %v1078_v9  ;;  %v1096_v9 = vld [vmem:[%s1468_s6] sm:$0xff]  }
  0x24   : > { %962 = vmatprep.subr.bf16.mxu1 %v1167_v1 }
  0x25   : > { %979 = vmatpush3.bf16.msra.mxu0 %v1085_v16 }
  0x26   : > { %980 = vmatprep.subr.bf16.mxu0 %v1167_v1 }
  0x27   : > { %963 = vmatpush3.bf16.msra.mxu1 %v1079_v10 }
  0x28   : > { %964 = vmatprep.subr.bf16.mxu1 %v1167_v1 }
  0x29   : > { %981 = vmatpush3.bf16.msra.mxu0 %v1086_v17 }
  0x2a   : > { %982 = vmatprep.subr.bf16.mxu0 %v1167_v1 }
  0x2b   : > { %965 = vmatpush3.bf16.msra.mxu1 %v1080_v11 }
  0x2c   : > { %966 = vmatprep.subr.bf16.mxu1 %v1167_v1 }
  0x2d   : > { %983 = vmatpush3.bf16.msra.mxu0 %v1087_v18 }
  0x2e   : > { %984 = vmatprep.subr.bf16.mxu0 %v1167_v1 }
  0x2f   : > { %967 = vmatpush3.bf16.msra.mxu1 %v1081_v12 }
  0x30   : > { %968 = vmatprep.subr.bf16.mxu1 %v1167_v1 }
  0x31   : > { %985 = vmatpush3.bf16.msra.mxu0 %v1088_v24 }
  0x32   : > { %986 = vmatprep.subr.bf16.mxu0 %v1167_v1 }
  0x33   : > { %969 = vmatpush3.bf16.msra.mxu1 %v1082_v13 }
  0x34   : > { %994 = vmatprep.subr.bf16.mxu1 %v1167_v1 }
  0x35   : > { %987 = vmatpush3.bf16.msra.mxu0 %v1089_v25 }
  0x36   : > { %988 = vmatprep.subr.bf16.mxu0 %v1167_v1 }
  0x39   : > { %989 = vmatpush3.bf16.msra.mxu0 %v1090_v26 }
  0xdc   : > { %v1342_v19 = vpop.f32.mrf.mxu0 }
  0xde   : > { %v952_v20 = vpop.f32.mrf.mxu0 }
  0xe0   : > { %v1344_v21 = vpop.f32.mrf.mxu0 }
  0xe1   : > { %v372_v22 = vpack.c.bf16 %v1344_v21, %v1342_v19  ;;  %v1067_v4 = vpack.i.bf16 %v1344_v21, %v1342_v19 }
  0xe2   : > { %v953_v23 = vpop.f32.mrf.mxu0 }
  0xe3   : > { %971 = vmatmul.mubr.bf16.vlgmr.msra.gmra.mxu1 %v372_v22 }
  0xe4   : > { %1006 = vmatprep.mubr.msk.bf16.mxu1 %vm1168_vm0, %v1167_v1  ;;  %995 = vmatpush3.bf16.msra.mxu1 %v1091_v2 }
  0xe5   : > { %996 = vmatprep.subr.bf16.mxu1 %v1167_v1 }
  0xe8   : > { %997 = vmatpush3.bf16.msra.mxu1 %v1092_v5 }
  0xe9   : > { %998 = vmatprep.subr.bf16.mxu1 %v1167_v1 }
  0xec   : > { %999 = vmatpush3.bf16.msra.mxu1 %v1093_v6 }
  0xed   : > { %1000 = vmatprep.subr.bf16.mxu1 %v1167_v1 }
  0xf0   : > { %1001 = vmatpush3.bf16.msra.mxu1 %v1094_v7 }
  0xf1   : > { %1002 = vmatprep.subr.bf16.mxu1 %v1167_v1 }
  0xf4   : > { %1003 = vmatpush3.bf16.msra.mxu1 %v1095_v8 }
  0xf5   : > { %1004 = vmatprep.subr.bf16.mxu1 %v1167_v1 }
  0xf8   : > { %1005 = vmatpush3.bf16.msra.mxu1 %v1096_v9 }
 0x1a3   : > { %v478_v28 = vpop.f32.mrf.mxu1 }
 0x1a4   : > { %v479_v30 = vadd.f32 %v886_v27, %v478_v28 }
 0x1a5   : > { %v972_v29 = vpop.f32.mrf.mxu1 }
 0x1a6   : > { %v485_v34 = vmax.f32 %v479_v30, 0.0 }
 0x1a7   : > { %v481_v31 = vpop.f32.mrf.mxu1 }
 0x1a8   : > { %v482_v32 = vadd.f32 %v886_v27, %v481_v31 }
 0x1a9   : > { %v973_v33 = vpop.f32.mrf.mxu1 }
 0x1aa   : > { %v486_v35 = vmax.f32 %v482_v32, 0.0 }
 0x1ac   : > { %v487_v36 = vpack.c.bf16 %v486_v35, %v485_v34 }
 0x1ae   : > { %991 = vmatmul.mubr.bf16.vlgmr.msra.gmra.mxu0 %v487_v36 }
 0x26e   : > { %v593_v40 = vpop.f32.mrf.mxu0 }
 0x26f   : > { %v594_v41 = vadd.f32 %v895_v39, %v593_v40 }
 0x270   : > { %v992_v42 = vpop.f32.mrf.mxu0 }
 0x271   : > { %v600_v43 = vsub.f32 0.0, %v594_v41 }
 0x272   : > { %v596_v44 = vpop.f32.mrf.mxu0 }
 0x273   : > { %v602_v45 = vmul.f32 1.442695, %v600_v43  ;;  %v597_v46 = vadd.f32 %v895_v39, %v596_v44 }
 0x274   : > { %v993_v47 = vpop.f32.mrf.mxu0 }
 0x275   : > { %1097 = vpow2.f32 %v602_v45  ;;  %v601_v48 = vsub.f32 0.0, %v597_v46 }
 0x277   : > { %v604_v49 = vmul.f32 1.442695, %v601_v48 }
 0x279   : > { %1099 = vpow2.f32 %v604_v49 }
 0x282   : > { %v1098_v50 = vpop.eup %1097 }
 0x283   : > { %v606_v51 = vadd.f32 1.0, %v1098_v50 }
 0x285   : > { %1101 = vrcp.f32 %v606_v51 }
 0x286   : > { %v1100_v52 = vpop.eup %1099 }
 0x287   : > { %v607_v53 = vadd.f32 1.0, %v1100_v52 }
 0x289   : > { %1103 = vrcp.f32 %v607_v53 }
 0x292   : > { %v1102_v54 = vpop.eup %1101 }
 0x293   : > { %v622_v55 = vsub.f32 1.0, %v1102_v54 }
 0x295   : > { %626 = vperm.xlu1 %1058, %v622_v55   ;;  %657 = vperm.xlu0 %1057, %v622_v55  }
 0x296   : > { %v1104_v56 = vpop.eup %1103 }
 0x297   : > { %v623_v57 = vsub.f32 1.0, %v1104_v56 }
 0x299   : > { %631 = vperm.xlu1 %1058, %v623_v57   ;;  %661 = vperm.xlu0 %1057, %v623_v57  }
 0x29d   : > { %1059 = vset.pattern.permute.xlu1 %v1169_v37  ;;  %647 = vperm.xlu0 %1057, %v1102_v54  }
 0x29e   : > { %651 = vperm.xlu1 %1059, %v1104_v56  }
 0x2a1   : > { %1060 = vset.pattern.permute.xlu0 %v1170_v38 }
 0x2a2   : > { %1061 = vset.pattern.permute.xlu1 %v1170_v38 }
 0x310   : > { %v627_v58 = vpop.permute.xlu1 %626  ;;  %v658_v59 = vpop.permute.xlu0 %657 }
 0x311   : > { %v664_v60 = vmul.f32 %v658_v59, %v1342_v19  ;;  %v634_v3 = vmul.f32 %v627_v58, %v1342_v19 }
 0x313   : > { %668 = vrot.lane.b32.xlu0 %v664_v60, %s1171_s23 }
 0x314   : > { %v662_v61 = vpop.permute.xlu0 %661  ;;  %v632_v63 = vpop.permute.xlu1 %631 }
 0x315   : > { %v665_v62 = vmul.f32 %v662_v61, %v1344_v21  ;;  %v635_v0 = vmul.f32 %v632_v63, %v1344_v21 }
 0x317   : > { %612 = vperm.xlu0 %1060, %v1102_v54   ;;  %670 = vrot.lane.b32.xlu1 %v665_v62, %s1171_s23 }
 0x318   : > { %v648_v10 = vpop.permute.xlu0 %647 }
 0x319   : > { %v652_v11 = vpop.permute.xlu1 %651  ;;  %v654_v13 = vmul.f32 %v648_v10, %v1342_v19 }
 0x31a   : > { %v655_v14 = vmul.f32 %v652_v11, %v1344_v21 }
 0x31b   : > { %640 = vrot.lane.b32.xlu0 %v635_v0, %s1172_s24  ;;  %617 = vperm.xlu1 %1061, %v1104_v56  }
 0x31c   : > { %1072 = vset.pattern.permute.xlu0 %v1169_v37  ;;  %v904_v37 = vld [vmem:[%s1469_s7] ss:$0 sm:$0xff] }
 0x31f   : > { %1068 = vrot.lane.b32.xlu0 %v1067_v4, %s1171_s23  ;;  %638 = vrot.lane.b32.xlu1 %v634_v3, %s1172_s24  ;;  %s1109_s24 = sshll.u32 %s1173_s22, 4  ;;  %s1110_s24 = int_to_ptr.vmem [resolvable:$false] %s1109_s24 }
 0x385   : > { %v669_v12 = vpop.permute.xlu0 %668 }
 0x386   : > { %v674_v16 = vadd.f32 %v669_v12, %v654_v13 }
 0x389   : > { %v671_v15 = vpop.permute.xlu1 %670 }
 0x38a   : > { %v675_v17 = vadd.f32 %v671_v15, %v655_v14 }
 0x38c   : > { %v1062_v18 = vpack.i.bf16 %v675_v17, %v674_v16 }
 0x38e   : > { %1063 = vrot.lane.b32.xlu1 %v1062_v18, %s1171_s23  ;;  %s297_s23 = sand.u32 1, %s1157_s28  }
 0x38f   : > { %s880_s25 = sshll.u32 %s297_s23, 4  ;;  %s1422_s21 = scalar_lea.sflag [#allocation3], %s297_s23 }
 0x390   : > { %s299_s12 = scalar_lea.vmem [#allocation2], %s880_s25  ;;  %s1111_s25 = scalar_lea.vmem %s1110_s24, 512 }
 0x391   : > { %s814_s13 = sshll.u32 %s299_s12, 4  ;;  %s1414_s13 = int_to_ptr.vmem [resolvable:$true] %s814_s13 }
 0x392   : > { %v613_v20 = vpop.permute.xlu0 %612  ;;  %s1105_s9 = scalar_lea.vmem %s1414_s13, 256  ;;  %p1112_p0 = scmp.lt.s32.totalorder %s1414_s13, %s1110_s24 }
 0x393   : > { %v620_v25 = vmul.f32 %v613_v20, %v1342_v19  ;;  %p1106_p11 = scmp.ne.s32.totalorder %s1414_s13, %s1105_s9  ;;  %p1113_p1 = scmp.lt.s32.totalorder %s1111_s25, %s1105_s9 }
 0x395   : > { %p1107_p12 = pnand %p1106_p11, %p1259_p5  ;;  %p1114_p2 = por %p1113_p1, %p1112_p0 }
 0x396   : > { %v618_v1 = vpop.permute.xlu1 %617  ;;  %v641_v22 = vpop.permute.xlu0 %640 }
 0x397   : > { %v621_v24 = vmul.f32 %v618_v1, %v1344_v21  ;;  %p1108_p13 = pneg %p1107_p12 }
 0x399   : > { %v645_v28 = vadd.f32 %v641_v22, %v621_v24  ;;  %p1115_p3 = pnand %p1114_p2, %p1108_p13 }
 0x39a   : > { %v639_v23 = vpop.permute.xlu1 %638  ;;  %v1069_v26 = vpop.permute.xlu0 %1068 }
 0x39b   : > { %v644_v29 = vadd.f32 %v639_v23, %v620_v25  ;;  %v1071_v32 = vunpack.i.h.bf16 %v1069_v26  ;;  %v1070_v33 = vunpack.i.l.bf16 %v1069_v26 }
 0x400   : > { %v1064_v27 = vpop.permute.xlu1 %1063 }
 0x401   : > { %v1066_v30 = vunpack.i.h.bf16 %v1064_v27  ;;  %v1065_v31 = vunpack.i.l.bf16 %v1064_v27 }
 0x403   : > { %v692_v34 = vsel %vm327_vm1, %v644_v29, %v1065_v31  ;;  %v693_v35 = vsel %vm327_vm1, %v645_v28, %v1066_v30 }
 0x404   : > { %v695_v36 = vsel %vm694_vm2, %v692_v34, %v1070_v33  ;;  %v696_v21 = vsel %vm694_vm2, %v693_v35, %v1071_v32 }
 0x405   : > { %v697_v19 = vpack.c.bf16 %v696_v21, %v695_v36 }
 0x407   : > { %1007 = vmatmul.mubr.msk.bf16.vlgmr.msra.gmra.mxu1 %vm753_vm3, %v697_v19 }
 0x4c7   : > { %v791_v38 = vpop.f32.mrf.mxu1 }
 0x4c8   : > { %v792_v39 = vadd.f32 %v904_v37, %v791_v38 }
 0x4c9   : > { %v1008_v40 = vpop.f32.mrf.mxu1 }
 0x4ca   : > { %798 = vst.msk [vmem:[%s299_s12] sm:$0xff] %vm694_vm2, %v792_v39 }
 0x4cb   : > { %v794_v41 = vpop.f32.mrf.mxu1 }
 0x4cc   : > { %v795_v42 = vadd.f32 %v904_v37, %v794_v41 }
 0x4cd   : > { %v1009_v43 = vpop.f32.mrf.mxu1 }
 0x4ce   : > { %799 = vst.msk [vmem:[%s299_s12 + $0x8] sm:$0xff] %vm694_vm2, %v795_v42 }
 0x4cf   : > { %1118 = shalt.err (!%p1115_p3)
}
 0x4d0   : > { %s1119_s23 = scalar_lea.hbm %s1419_s20, 256  ;;  %s1123_s12 = scalar_lea.hbm %s1470_s8, 512 }
 0x4d1   : > { %p1120_p4 = scmp.ne.s32.totalorder %s1419_s20, %s1119_s23  ;;  %p1124_p9 = scmp.lt.s32.totalorder %s1419_s20, %s1470_s8 }
 0x4d2   : > { %p1125_p10 = scmp.lt.s32.totalorder %s1123_s12, %s1119_s23 }
 0x4d3   : > { %p1121_p7 = pnand %p1120_p4, %p1259_p5 }
 0x4d4   : > { %p1126_p11 = por %p1125_p10, %p1124_p9 }
 0x4d5   : > { %p1122_p8 = pneg %p1121_p7 }
 0x4d7   : > { %p1127_p12 = pnand %p1126_p11, %p1122_p8 }
 0x4d9   : > { %1130 = shalt.err (!%p1127_p12)
}
 0x4da   : > { %s1174_s19 = smov 128   ;;  %s1175_s9 = smov 8  }
 0x4db   : > { %1010 = dma.vmem_to_hbm [thread:$0]  (%p1259_p5), %s1414_s13, 256, %s1419_s20, %s1422_s21, %s1174_s19, %s1174_s19, %s1175_s9  }
 0x4dc PF: > { %p1016_p13 = scmp.ge.s32.totalorder %s1165_s30, 2  ;;  %s829_s22 = sand.u32 1, %s1153_s27  }
 0x4dd   : > { %s830_s24 = scalar_lea.sflag [#allocation3], %s829_s22 }
 0x4de   : > { %p1013_p0 = pnand %p1016_p13, %p1263_p6 }
 0x4e0   : > { %p1014_p1 = pneg %p1013_p0 }
 0x4e2   : > { %1148 = dma.done.wait (%p1014_p1), %s830_s24, 256  }
 0x4e3   : > { %1150 = vsyncadd (%p1014_p1), %s830_s24, 4294967040  ;;  %p18_p2 = scmp.ge.s32.totalorder %s1246_s11, 4   ;;  %s1473_s27 = smov %s1157_s28 }
 0x4e4   : > { %s1474_s28 = smov %s1161_s29  ;;  %s1475_s29 = smov %s1257_s14 }
 0x4e5   : > { %s1476_s30 = smov %s1246_s11  ;;  %20 = sbr.rel (!%p18_p2) target bundleno = 3 (0x3), region = 87 }
 0x4ea   :  { %835 = vsyncpa [#allocation3], 1 }
 0x4eb   :  { %837 = vsyncpa [#allocation3 + $0x1], 1 }

// kernel: tpu_custom_call.1
= control target key start
LH: loop header
LB: loop body
LE: loop exit
PB: predicated region body
PF: predicated region fallthrough
CT: control target
= control target key end

     0   :  { %13 = vsyncpa [#allocation3], 0  ;;  %s1462_s0 = inlined_call_operand.vmem [shape: f32[32,32], index: 0, kind: input, shape index: {}]   ;;  %s1463_s1 = inlined_call_operand.vmem [shape: bf16[32,128], index: 1, kind: input, shape index: {}]   ;;  %s1464_s2 = inlined_call_operand.vmem [shape: bf16[128,128], index: 2, kind: input, shape index: {}]   ;;  %s1465_s3 = inlined_call_operand.vmem [shape: f32[1,128], index: 3, kind: input, shape index: {}]   ;;  %s1466_s4 = inlined_call_operand.vmem [shape: bf16[128,2], index: 4, kind: input, shape index: {}]   ;;  %s1467_s5 = inlined_call_operand.vmem [shape: f32[1,2], index: 5, kind: input, shape index: {}]   ;;  %s1468_s6 = inlined_call_operand.vmem [shape: bf16[96,64], index: 6, kind: input, shape index: {}]   ;;  %s1469_s7 = inlined_call_operand.vmem [shape: f32[1,64], index: 7, kind: input, shape index: {}]   ;;  %s1470_s8 = inlined_call_operand.hbm [shape: f32[32,64], index: 8, kind: output, shape index: {}]  }
   0x1   :  { %15 = vsyncpa [#allocation3 + $0x1], 0  ;;  %s1221_s27 = smov 0   ;;  %s1223_s28 = smov 0  }
   0x2   :  { %s1225_s29 = smov 0   ;;  %s1227_s30 = smov 0  }
   0x3 LB: > { %s1242_s9 = sadd.s32 4294967295, %s1165_s30   ;;  %s876_s10 = sadd.s32 4294967294, %s1165_s30   ;;  %s1165_s30 = sphi %s1227_s30, %s1476_s30   ;;  %s1161_s29 = sphi %s1225_s29, %s1475_s29   ;;  %s1157_s28 = sphi %s1223_s28, %s1474_s28   ;;  %s1153_s27 = sphi %s1221_s27, %s1473_s27  }
   0x4   : > { %s1246_s11 = sadd.s32 1, %s1165_s30   ;;  %s201_s12 = sadd.s32 1, %s1161_s29 }
   0x5   : > { %s198_s13 = ssub.s32 %s1165_s30, %s1246_s11  ;;  %p211_p0 = scmp.ne.s32.totalorder %s1161_s29, %s1157_s28 }
   0x6   : > { %p199_p1 = scmp.eq.s32.totalorder %s198_s13, 0  ;;  %p212_p2 = scmp.eq.s32.totalorder %s1242_s9, 1 }
   0x7   : > { %p217_p3 = scmp.ne.s32.totalorder %s1157_s28, %s1153_s27  ;;  %p218_p4 = scmp.eq.s32.totalorder %s876_s10, 1 }
   0x8   : > { %s1257_s14 = scalar_select %p199_p1, %s1161_s29, %s201_s12  }
   0x9   : > { %p1259_p5 = por %p212_p2, %p211_p0  ;;  %p1263_p6 = por %p218_p4, %p217_p3 }
   0xa   : > { %p879_p7 = scmp.ge.s32.totalorder %s1165_s30, 1  ;;  %p266_p8 = scmp.lt.s32.totalorder %s1165_s30, 3 }
   0xc   : > { %p267_p9 = pnand %p879_p7, %p266_p8 }
   0xd   : > { %s881_s21 = sshll.u32 (!%p267_p9), %s1242_s9, 1  ;;  %s1171_s23 = smov (!%p267_p9), 32  }
   0xe   : > { %270 = sbr.rel (%p267_p9) target bundleno = 1244 (0x4dc), region = 52  ;;  %p301_p10 = scmp.lt.s32.totalorder (!%p267_p9), %s881_s21, 3 }
   0xf   : > { %s1172_s24 = smov (!%p267_p9), 64   ;;  %s917_s17 = sshll.u32 (!%p267_p9), %s1242_s9, 8 }
  0x10   : > { %s1419_s20 = scalar_lea.hbm (!%p267_p9), %s1470_s8, %s917_s17  ;;  %s1173_s22 = smov (!%p267_p9), [#allocation2]  }
  0x13   : > { %v1073_v0 = vld [vmem:[%s1463_s1 + $0x8] sm:$0xff]   ;;  %v1167_v1 = vmov 0.0   ;;  %v1074_v2 = vld [vmem:[%s1463_s1] sm:$0xff]   ;;  %vm1168_vm0 = vmmov 0   ;;  %v1075_v3 = vld [vmem:[%s1464_s2 + $0x38] sm:$0xff]   ;;  %s1478_s21 = smov (!%p301_p10, %s881_s21), 3 }
  0x14   : > { %946 = vmatprep.subr.bf16.mxu0 %v1167_v1  ;;  %954 = vmatprep.subr.bf16.mxu1 %v1167_v1  ;;  %v1076_v4 = vld [vmem:[%s1464_s2 + $0x30] sm:$0xff]   ;;  %s882_s26 = sshll.u32 %s1478_s21, 3  ;;  %v1077_v5 = vld [vmem:[%s1464_s2 + $0x28] sm:$0xff]   ;;  %vm327_vm1 = vcmask 261120   ;;  %v1078_v9 = vld [vmem:[%s1464_s2 + $0x20] sm:$0xff]   ;;  %v1169_v37 = vmov 1  }
  0x15   : > { %947 = vmatpush3.bf16.msra.mxu0 %v1073_v0  ;;  %950 = vmatprep.mubr.msk.bf16.mxu0 %vm1168_vm0, %v1167_v1  ;;  %s304_s13 = scalar_lea.vmem %s1462_s0, %s882_s26  ;;  %v1079_v10 = vld [vmem:[%s1464_s2 + $0x18] sm:$0xff]   ;;  %v1080_v11 = vld [vmem:[%s1464_s2 + $0x10] sm:$0xff]   ;;  %v1081_v12 = vld [vmem:[%s1464_s2 + $0x8] sm:$0xff]   ;;  %v1170_v38 = vmov 0   ;;  %vm694_vm2 = vcmask 523264   ;;  %vm753_vm3 = vcmask 785408  }
  0x16   : > { %948 = vmatprep.subr.bf16.mxu0 %v1167_v1  ;;  %970 = vmatprep.mubr.msk.bf16.mxu1 %vm1168_vm0, %v1167_v1  ;;  %v308_v6 = vld [vmem:[%s304_s13] sm:$0xff]  ;;  %v309_v7 = vld [vmem:[%s304_s13 + $0x8] sm:$0xff]  ;;  %v1083_v14 = vld [vmem:[%s1466_s4 + $0x38] sm:$0xff]  }
  0x17   : > { %955 = vmatpush3.bf16.msra.mxu1 %v1075_v3  ;;  %v310_v8 = vpack.c.bf16 %v309_v7, %v308_v6  ;;  %v1082_v13 = vld [vmem:[%s1464_s2] sm:$0xff]   ;;  %v1084_v15 = vld [vmem:[%s1466_s4 + $0x30] sm:$0xff]   ;;  %v1085_v16 = vld [vmem:[%s1466_s4 + $0x28] sm:$0xff]   ;;  %1057 = vset.pattern.permute.xlu0 %v1169_v37 }
  0x18   : > { %956 = vmatprep.subr.bf16.mxu1 %v1167_v1  ;;  %v1086_v17 = vld [vmem:[%s1466_s4 + $0x20] sm:$0xff]   ;;  %v1087_v18 = vld [vmem:[%s1466_s4 + $0x18] sm:$0xff]   ;;  %v1088_v24 = vld [vmem:[%s1466_s4 + $0x10] sm:$0xff]   ;;  %1058 = vset.pattern.permute.xlu1 %v1170_v38 }
  0x19   : > { %949 = vmatpush3.bf16.msra.mxu0 %v1074_v2  ;;  %v1089_v25 = vld [vmem:[%s1466_s4 + $0x8] sm:$0xff]   ;;  %v1090_v26 = vld [vmem:[%s1466_s4] sm:$0xff]   ;;  %v1093_v6 = vld [vmem:[%s1468_s6 + $0x18] sm:$0xff]  }
  0x1a   : > { %974 = vmatprep.subr.bf16.mxu0 %v1167_v1  ;;  %v886_v27 = vld [vmem:[%s1465_s3] ss:$0 sm:$0xff]  ;;  %v1091_v2 = vld [vmem:[%s1468_s6 + $0x28] sm:$0xff]   ;;  %v1094_v7 = vld [vmem:[%s1468_s6 + $0x10] sm:$0xff]  }
  0x1b   : > { %957 = vmatpush3.bf16.msra.mxu1 %v1076_v4  ;;  %v895_v39 = vld [vmem:[%s1467_s5] ss:$0 sm:$0xff] }
  0x1c   : > { %958 = vmatprep.subr.bf16.mxu1 %v1167_v1  ;;  %951 = vmatmul.mubr.msk.bf16.vlgmr.msra.gmra.mxu0 %vm327_vm1, %v310_v8  ;;  %v1095_v8 = vld [vmem:[%s1468_s6 + $0x8] sm:$0xff]  }
  0x1d   : > { %990 = vmatprep.mubr.msk.bf16.mxu0 %vm1168_vm0, %v1167_v1  ;;  %975 = vmatpush3.bf16.msra.mxu0 %v1083_v14 }
  0x1e   : > { %976 = vmatprep.subr.bf16.mxu0 %v1167_v1 }
  0x1f   : > { %959 = vmatpush3.bf16.msra.mxu1 %v1077_v5  ;;  %v1092_v5 = vld [vmem:[%s1468_s6 + $0x20] sm:$0xff]  }
  0x20   : > { %960 = vmatprep.subr.bf16.mxu1 %v1167_v1 }
  0x21   : > { %977 = vmatpush3.bf16.msra.mxu0 %v1084_v15 }
  0x22   : > { %978 = vmatprep.subr.bf16.mxu0 %v1167_v1 }
  0x23   : > { %961 = vmatpush3.bf16.msra.mxu1 %v1078_v9  ;;  %v1096_v9 = vld [vmem:[%s1468_s6] sm:$0xff]  }
  0x24   : > { %962 = vmatprep.subr.bf16.mxu1 %v1167_v1 }
  0x25   : > { %979 = vmatpush3.bf16.msra.mxu0 %v1085_v16 }
  0x26   : > { %980 = vmatprep.subr.bf16.mxu0 %v1167_v1 }
  0x27   : > { %963 = vmatpush3.bf16.msra.mxu1 %v1079_v10 }
  0x28   : > { %964 = vmatprep.subr.bf16.mxu1 %v1167_v1 }
  0x29   : > { %981 = vmatpush3.bf16.msra.mxu0 %v1086_v17 }
  0x2a   : > { %982 = vmatprep.subr.bf16.mxu0 %v1167_v1 }
  0x2b   : > { %965 = vmatpush3.bf16.msra.mxu1 %v1080_v11 }
  0x2c   : > { %966 = vmatprep.subr.bf16.mxu1 %v1167_v1 }
  0x2d   : > { %983 = vmatpush3.bf16.msra.mxu0 %v1087_v18 }
  0x2e   : > { %984 = vmatprep.subr.bf16.mxu0 %v1167_v1 }
  0x2f   : > { %967 = vmatpush3.bf16.msra.mxu1 %v1081_v12 }
  0x30   : > { %968 = vmatprep.subr.bf16.mxu1 %v1167_v1 }
  0x31   : > { %985 = vmatpush3.bf16.msra.mxu0 %v1088_v24 }
  0x32   : > { %986 = vmatprep.subr.bf16.mxu0 %v1167_v1 }
  0x33   : > { %969 = vmatpush3.bf16.msra.mxu1 %v1082_v13 }
  0x34   : > { %994 = vmatprep.subr.bf16.mxu1 %v1167_v1 }
  0x35   : > { %987 = vmatpush3.bf16.msra.mxu0 %v1089_v25 }
  0x36   : > { %988 = vmatprep.subr.bf16.mxu0 %v1167_v1 }
  0x39   : > { %989 = vmatpush3.bf16.msra.mxu0 %v1090_v26 }
  0xdc   : > { %v1342_v19 = vpop.f32.mrf.mxu0 }
  0xde   : > { %v952_v20 = vpop.f32.mrf.mxu0 }
  0xe0   : > { %v1344_v21 = vpop.f32.mrf.mxu0 }
  0xe1   : > { %v372_v22 = vpack.c.bf16 %v1344_v21, %v1342_v19  ;;  %v1067_v4 = vpack.i.bf16 %v1344_v21, %v1342_v19 }
  0xe2   : > { %v953_v23 = vpop.f32.mrf.mxu0 }
  0xe3   : > { %971 = vmatmul.mubr.bf16.vlgmr.msra.gmra.mxu1 %v372_v22 }
  0xe4   : > { %1006 = vmatprep.mubr.msk.bf16.mxu1 %vm1168_vm0, %v1167_v1  ;;  %995 = vmatpush3.bf16.msra.mxu1 %v1091_v2 }
  0xe5   : > { %996 = vmatprep.subr.bf16.mxu1 %v1167_v1 }
  0xe8   : > { %997 = vmatpush3.bf16.msra.mxu1 %v1092_v5 }
  0xe9   : > { %998 = vmatprep.subr.bf16.mxu1 %v1167_v1 }
  0xec   : > { %999 = vmatpush3.bf16.msra.mxu1 %v1093_v6 }
  0xed   : > { %1000 = vmatprep.subr.bf16.mxu1 %v1167_v1 }
  0xf0   : > { %1001 = vmatpush3.bf16.msra.mxu1 %v1094_v7 }
  0xf1   : > { %1002 = vmatprep.subr.bf16.mxu1 %v1167_v1 }
  0xf4   : > { %1003 = vmatpush3.bf16.msra.mxu1 %v1095_v8 }
  0xf5   : > { %1004 = vmatprep.subr.bf16.mxu1 %v1167_v1 }
  0xf8   : > { %1005 = vmatpush3.bf16.msra.mxu1 %v1096_v9 }
 0x1a3   : > { %v478_v28 = vpop.f32.mrf.mxu1 }
 0x1a4   : > { %v479_v30 = vadd.f32 %v886_v27, %v478_v28 }
 0x1a5   : > { %v972_v29 = vpop.f32.mrf.mxu1 }
 0x1a6   : > { %v485_v34 = vmax.f32 %v479_v30, 0.0 }
 0x1a7   : > { %v481_v31 = vpop.f32.mrf.mxu1 }
 0x1a8   : > { %v482_v32 = vadd.f32 %v886_v27, %v481_v31 }
 0x1a9   : > { %v973_v33 = vpop.f32.mrf.mxu1 }
 0x1aa   : > { %v486_v35 = vmax.f32 %v482_v32, 0.0 }
 0x1ac   : > { %v487_v36 = vpack.c.bf16 %v486_v35, %v485_v34 }
 0x1ae   : > { %991 = vmatmul.mubr.bf16.vlgmr.msra.gmra.mxu0 %v487_v36 }
 0x26e   : > { %v593_v40 = vpop.f32.mrf.mxu0 }
 0x26f   : > { %v594_v41 = vadd.f32 %v895_v39, %v593_v40 }
 0x270   : > { %v992_v42 = vpop.f32.mrf.mxu0 }
 0x271   : > { %v600_v43 = vsub.f32 0.0, %v594_v41 }
 0x272   : > { %v596_v44 = vpop.f32.mrf.mxu0 }
 0x273   : > { %v602_v45 = vmul.f32 1.442695, %v600_v43  ;;  %v597_v46 = vadd.f32 %v895_v39, %v596_v44 }
 0x274   : > { %v993_v47 = vpop.f32.mrf.mxu0 }
 0x275   : > { %1097 = vpow2.f32 %v602_v45  ;;  %v601_v48 = vsub.f32 0.0, %v597_v46 }
 0x277   : > { %v604_v49 = vmul.f32 1.442695, %v601_v48 }
 0x279   : > { %1099 = vpow2.f32 %v604_v49 }
 0x282   : > { %v1098_v50 = vpop.eup %1097 }
 0x283   : > { %v606_v51 = vadd.f32 1.0, %v1098_v50 }
 0x285   : > { %1101 = vrcp.f32 %v606_v51 }
 0x286   : > { %v1100_v52 = vpop.eup %1099 }
 0x287   : > { %v607_v53 = vadd.f32 1.0, %v1100_v52 }
 0x289   : > { %1103 = vrcp.f32 %v607_v53 }
 0x292   : > { %v1102_v54 = vpop.eup %1101 }
 0x293   : > { %v622_v55 = vsub.f32 1.0, %v1102_v54 }
 0x295   : > { %626 = vperm.xlu1 %1058, %v622_v55   ;;  %657 = vperm.xlu0 %1057, %v622_v55  }
 0x296   : > { %v1104_v56 = vpop.eup %1103 }
 0x297   : > { %v623_v57 = vsub.f32 1.0, %v1104_v56 }
 0x299   : > { %631 = vperm.xlu1 %1058, %v623_v57   ;;  %661 = vperm.xlu0 %1057, %v623_v57  }
 0x29d   : > { %1059 = vset.pattern.permute.xlu1 %v1169_v37  ;;  %647 = vperm.xlu0 %1057, %v1102_v54  }
 0x29e   : > { %651 = vperm.xlu1 %1059, %v1104_v56  }
 0x2a1   : > { %1060 = vset.pattern.permute.xlu0 %v1170_v38 }
 0x2a2   : > { %1061 = vset.pattern.permute.xlu1 %v1170_v38 }
 0x310   : > { %v627_v58 = vpop.permute.xlu1 %626  ;;  %v658_v59 = vpop.permute.xlu0 %657 }
 0x311   : > { %v664_v60 = vmul.f32 %v658_v59, %v1342_v19  ;;  %v634_v3 = vmul.f32 %v627_v58, %v1342_v19 }
 0x313   : > { %668 = vrot.lane.b32.xlu0 %v664_v60, %s1171_s23 }
 0x314   : > { %v662_v61 = vpop.permute.xlu0 %661  ;;  %v632_v63 = vpop.permute.xlu1 %631 }
 0x315   : > { %v665_v62 = vmul.f32 %v662_v61, %v1344_v21  ;;  %v635_v0 = vmul.f32 %v632_v63, %v1344_v21 }
 0x317   : > { %612 = vperm.xlu0 %1060, %v1102_v54   ;;  %670 = vrot.lane.b32.xlu1 %v665_v62, %s1171_s23 }
 0x318   : > { %v648_v10 = vpop.permute.xlu0 %647 }
 0x319   : > { %v652_v11 = vpop.permute.xlu1 %651  ;;  %v654_v13 = vmul.f32 %v648_v10, %v1342_v19 }
 0x31a   : > { %v655_v14 = vmul.f32 %v652_v11, %v1344_v21 }
 0x31b   : > { %640 = vrot.lane.b32.xlu0 %v635_v0, %s1172_s24  ;;  %617 = vperm.xlu1 %1061, %v1104_v56  }
 0x31c   : > { %1072 = vset.pattern.permute.xlu0 %v1169_v37  ;;  %v904_v37 = vld [vmem:[%s1469_s7] ss:$0 sm:$0xff] }
 0x31f   : > { %1068 = vrot.lane.b32.xlu0 %v1067_v4, %s1171_s23  ;;  %638 = vrot.lane.b32.xlu1 %v634_v3, %s1172_s24  ;;  %s1109_s24 = sshll.u32 %s1173_s22, 4  ;;  %s1110_s24 = int_to_ptr.vmem [resolvable:$false] %s1109_s24 }
 0x385   : > { %v669_v12 = vpop.permute.xlu0 %668 }
 0x386   : > { %v674_v16 = vadd.f32 %v669_v12, %v654_v13 }
 0x389   : > { %v671_v15 = vpop.permute.xlu1 %670 }
 0x38a   : > { %v675_v17 = vadd.f32 %v671_v15, %v655_v14 }
 0x38c   : > { %v1062_v18 = vpack.i.bf16 %v675_v17, %v674_v16 }
 0x38e   : > { %1063 = vrot.lane.b32.xlu1 %v1062_v18, %s1171_s23  ;;  %s297_s23 = sand.u32 1, %s1157_s28  }
 0x38f   : > { %s880_s25 = sshll.u32 %s297_s23, 4  ;;  %s1422_s21 = scalar_lea.sflag [#allocation3], %s297_s23 }
 0x390   : > { %s299_s12 = scalar_lea.vmem [#allocation2], %s880_s25  ;;  %s1111_s25 = scalar_lea.vmem %s1110_s24, 512 }
 0x391   : > { %s814_s13 = sshll.u32 %s299_s12, 4  ;;  %s1414_s13 = int_to_ptr.vmem [resolvable:$true] %s814_s13 }
 0x392   : > { %v613_v20 = vpop.permute.xlu0 %612  ;;  %s1105_s9 = scalar_lea.vmem %s1414_s13, 256  ;;  %p1112_p0 = scmp.lt.s32.totalorder %s1414_s13, %s1110_s24 }
 0x393   : > { %v620_v25 = vmul.f32 %v613_v20, %v1342_v19  ;;  %p1106_p11 = scmp.ne.s32.totalorder %s1414_s13, %s1105_s9  ;;  %p1113_p1 = scmp.lt.s32.totalorder %s1111_s25, %s1105_s9 }
 0x395   : > { %p1107_p12 = pnand %p1106_p11, %p1259_p5  ;;  %p1114_p2 = por %p1113_p1, %p1112_p0 }
 0x396   : > { %v618_v1 = vpop.permute.xlu1 %617  ;;  %v641_v22 = vpop.permute.xlu0 %640 }
 0x397   : > { %v621_v24 = vmul.f32 %v618_v1, %v1344_v21  ;;  %p1108_p13 = pneg %p1107_p12 }
 0x399   : > { %v645_v28 = vadd.f32 %v641_v22, %v621_v24  ;;  %p1115_p3 = pnand %p1114_p2, %p1108_p13 }
 0x39a   : > { %v639_v23 = vpop.permute.xlu1 %638  ;;  %v1069_v26 = vpop.permute.xlu0 %1068 }
 0x39b   : > { %v644_v29 = vadd.f32 %v639_v23, %v620_v25  ;;  %v1071_v32 = vunpack.i.h.bf16 %v1069_v26  ;;  %v1070_v33 = vunpack.i.l.bf16 %v1069_v26 }
 0x400   : > { %v1064_v27 = vpop.permute.xlu1 %1063 }
 0x401   : > { %v1066_v30 = vunpack.i.h.bf16 %v1064_v27  ;;  %v1065_v31 = vunpack.i.l.bf16 %v1064_v27 }
 0x403   : > { %v692_v34 = vsel %vm327_vm1, %v644_v29, %v1065_v31  ;;  %v693_v35 = vsel %vm327_vm1, %v645_v28, %v1066_v30 }
 0x404   : > { %v695_v36 = vsel %vm694_vm2, %v692_v34, %v1070_v33  ;;  %v696_v21 = vsel %vm694_vm2, %v693_v35, %v1071_v32 }
 0x405   : > { %v697_v19 = vpack.c.bf16 %v696_v21, %v695_v36 }
 0x407   : > { %1007 = vmatmul.mubr.msk.bf16.vlgmr.msra.gmra.mxu1 %vm753_vm3, %v697_v19 }
 0x4c7   : > { %v791_v38 = vpop.f32.mrf.mxu1 }
 0x4c8   : > { %v792_v39 = vadd.f32 %v904_v37, %v791_v38 }
 0x4c9   : > { %v1008_v40 = vpop.f32.mrf.mxu1 }
 0x4ca   : > { %798 = vst.msk [vmem:[%s299_s12] sm:$0xff] %vm694_vm2, %v792_v39 }
 0x4cb   : > { %v794_v41 = vpop.f32.mrf.mxu1 }
 0x4cc   : > { %v795_v42 = vadd.f32 %v904_v37, %v794_v41 }
 0x4cd   : > { %v1009_v43 = vpop.f32.mrf.mxu1 }
 0x4ce   : > { %799 = vst.msk [vmem:[%s299_s12 + $0x8] sm:$0xff] %vm694_vm2, %v795_v42 }
 0x4cf   : > { %1118 = shalt.err (!%p1115_p3)
}
 0x4d0   : > { %s1119_s23 = scalar_lea.hbm %s1419_s20, 256  ;;  %s1123_s12 = scalar_lea.hbm %s1470_s8, 512 }
 0x4d1   : > { %p1120_p4 = scmp.ne.s32.totalorder %s1419_s20, %s1119_s23  ;;  %p1124_p9 = scmp.lt.s32.totalorder %s1419_s20, %s1470_s8 }
 0x4d2   : > { %p1125_p10 = scmp.lt.s32.totalorder %s1123_s12, %s1119_s23 }
 0x4d3   : > { %p1121_p7 = pnand %p1120_p4, %p1259_p5 }
 0x4d4   : > { %p1126_p11 = por %p1125_p10, %p1124_p9 }
 0x4d5   : > { %p1122_p8 = pneg %p1121_p7 }
 0x4d7   : > { %p1127_p12 = pnand %p1126_p11, %p1122_p8 }
 0x4d9   : > { %1130 = shalt.err (!%p1127_p12)
}
 0x4da   : > { %s1174_s19 = smov 128   ;;  %s1175_s9 = smov 8  }
 0x4db   : > { %1010 = dma.vmem_to_hbm [thread:$0]  (%p1259_p5), %s1414_s13, 256, %s1419_s20, %s1422_s21, %s1174_s19, %s1174_s19, %s1175_s9  }
 0x4dc PF: > { %p1016_p13 = scmp.ge.s32.totalorder %s1165_s30, 2  ;;  %s829_s22 = sand.u32 1, %s1153_s27  }
 0x4dd   : > { %s830_s24 = scalar_lea.sflag [#allocation3], %s829_s22 }
 0x4de   : > { %p1013_p0 = pnand %p1016_p13, %p1263_p6 }
 0x4e0   : > { %p1014_p1 = pneg %p1013_p0 }
 0x4e2   : > { %1148 = dma.done.wait (%p1014_p1), %s830_s24, 256  }
 0x4e3   : > { %1150 = vsyncadd (%p1014_p1), %s830_s24, 4294967040  ;;  %p18_p2 = scmp.ge.s32.totalorder %s1246_s11, 4   ;;  %s1473_s27 = smov %s1157_s28 }
 0x4e4   : > { %s1474_s28 = smov %s1161_s29  ;;  %s1475_s29 = smov %s1257_s14 }
 0x4e5   : > { %s1476_s30 = smov %s1246_s11  ;;  %20 = sbr.rel (!%p18_p2) target bundleno = 3 (0x3), region = 87 }
 0x4ea   :  { %835 = vsyncpa [#allocation3], 1 }
 0x4eb   :  { %837 = vsyncpa [#allocation3 + $0x1], 1 }

</bundles_post_ra>
